<compile_context>
chip_gen: v7x
topology: tpu7x:2x2x1
jax: 0.10.0
libtpu: 0.0.40
codegen_flags: <defaults>
</compile_context>

<pallas_src>
import functools

import jax
import jax.numpy as jnp
from jax.experimental import pallas as pl
from jax.experimental.pallas import tpu as pltpu


def _causal_graph_kernel(x_ref, w_ref, b_ref, o_ref, *, mxu_dtype=None):
    # x_ref: (bblk, S, D); w_ref: (D, D) pre-transposed so y = x @ w + b;
    # b_ref: (1, D); o_ref: (bblk, S*D)  (lane-dense output slab).
    bblk, S, D = x_ref.shape

    x = x_ref[...].astype(jnp.float32)
    w = w_ref[...].astype(jnp.float32)
    b = b_ref[...].astype(jnp.float32)

    # node_features = relu(x @ W^T + b): one fused (bblk*S, D) @ (D, D) matmul.
    x2 = x.reshape(bblk * S, D)                 # merges leading dims only: free
    node2 = jnp.dot(x2, w, preferred_element_type=jnp.float32) + b
    node2 = jnp.maximum(node2, 0.0)
    node = node2.reshape(bblk, S, D)

    # Optionally feed bf16 operands to the MXU (v6e/v7x); accumulate in f32.
    node_mm = node if mxu_dtype is None else node.astype(mxu_dtype)

    # edge scores = node @ node^T; contract the last dims of both operands so
    # no explicit transpose / XLU relayout is materialized.
    scores = jnp.einsum("bsd,btd->bst", node_mm, node_mm,
                        preferred_element_type=jnp.float32)      # (bblk, S, S)

    # Softmax over the last axis -- all math in f32, exact division (the
    # approximate EUP reciprocal costs ~1e-3 rel err and broke the check).
    scores = scores - jnp.max(scores, axis=-1, keepdims=True)
    p = jnp.exp(scores)
    p = p / jnp.sum(p, axis=-1, keepdims=True)

    p_mm = p if mxu_dtype is None else p.astype(mxu_dtype)
    enriched = jnp.einsum("bst,btd->bsd", p_mm, node_mm,
                          preferred_element_type=jnp.float32)    # (bblk, S, D)

    # Lane-dense store: fold (S, D) -> S*D (= 256) lanes so the write-back is
    # an unmasked vst instead of a 25%-lane masked store at D=32.
    o_ref[...] = enriched.reshape(bblk, S * D).astype(o_ref.dtype)


def _device_info():
    """Best-effort (VMEM bytes, #TensorCores); conservative fallbacks."""
    vmem_bytes = 64 << 20          # v7x per-core VMEM (smallest of the fleet)
    num_cores = 1                  # v5e / v6e: one TensorCore per chip
    try:
        info = pltpu.get_tpu_info()
        vmem_bytes = int(getattr(info, "vmem_capacity_bytes", vmem_bytes))
        for attr in ("num_cores", "tensorcore_count", "cores_per_chip",
                     "num_tensorcores"):
            v = getattr(info, attr, None)
            if v:
                num_cores = int(v)
                break
    except Exception:
        pass
    return vmem_bytes, num_cores


def _bytes_per_batch_elem(S, D):
    # f32: double-buffered input + output blocks, plus scores / node / enriched
    # intermediates that live in VMEM per grid step.
    return 4 * (2 * S * D + 2 * S * D + S * S + 2 * S * D)


def _choose_bblk(B, S, D, vmem_bytes, num_cores, max_bblk):
    bytes_per_b = _bytes_per_batch_elem(S, D)
    budget = vmem_bytes // 2                       # headroom for compiler temps
    cap = max(1, min(max_bblk, budget // max(bytes_per_b, 1)))
    if num_cores > 1:
        # Keep >= num_cores grid steps so ("parallel",) can shard across TCs.
        cap = min(cap, max(1, B // num_cores))
    if cap >= B or B <= 8:
        return B                                   # grid = 1 on 1-TC chips / tiny B
    # Keep the lane-dense output block's sublane dim a multiple of 8.
    return max(8, (cap // 8) * 8)


def causal_graph_encoder(x, w_node, b_node, *, max_bblk=256, mxu_dtype=None,
                         out_dtype=None):
    """x: (B, S, D); w_node: (D, D) torch nn.Linear layout (out, in); b_node: (D,)."""
    B, S, D = x.shape
    out_dtype = out_dtype or x.dtype

    vmem_bytes, num_cores = _device_info()
    bblk = _choose_bblk(B, S, D, vmem_bytes, num_cores, max_bblk)

    # Pad B up to a multiple of bblk (padded rows are computed then sliced off).
    Bp = ((B + bblk - 1) // bblk) * bblk
    if Bp != B:
        x = jnp.pad(x, ((0, Bp - B), (0, 0), (0, 0)))
    grid = Bp // bblk

    # nn.Linear computes x @ W^T + b -> pre-transpose W once in the wrapper.
    w_t = jnp.transpose(w_node).astype(x.dtype)          # (D, D)
    b2 = b_node.reshape(1, D).astype(jnp.float32)        # broadcasts over rows

    flops = 2 * Bp * S * D * D + 2 * (2 * Bp * S * S * D)
    bytes_accessed = 4 * (2 * Bp * S * D + D * D + D)
    cost = pl.CostEstimate(flops=flops, transcendentals=Bp * S * S,
                           bytes_accessed=bytes_accessed)

    vmem_need = bblk * _bytes_per_batch_elem(S, D) + 8 * (D * D + D) + (1 << 20)
    vmem_limit = int(min(vmem_bytes, max(32 << 20, 2 * vmem_need)))

    kernel = functools.partial(_causal_graph_kernel, mxu_dtype=mxu_dtype)

    out2 = pl.pallas_call(
        kernel,
        out_shape=jax.ShapeDtypeStruct((Bp, S * D), out_dtype),
        grid_spec=pltpu.PrefetchScalarGridSpec(
            num_scalar_prefetch=0,
            grid=(grid,),
            in_specs=[
                pl.BlockSpec((bblk, S, D), lambda i: (i, 0, 0)),   # x block
                pl.BlockSpec((D, D), lambda i: (0, 0)),            # weight (resident)
                pl.BlockSpec((1, D), lambda i: (0, 0)),            # bias (resident)
            ],
            out_specs=pl.BlockSpec((bblk, S * D), lambda i: (i, 0)),
        ),
        compiler_params=pltpu.CompilerParams(
            dimension_semantics=("parallel",),
            vmem_limit_bytes=vmem_limit,
        ),
        cost_estimate=cost,
    )(x, w_t, b2)

    out = out2.reshape(Bp, S, D)                  # metadata-only reshape in XLA
    if Bp != B:
        out = out[:B]
    return out


def _reference(x, w_node, b_node):
    node = jnp.maximum(jnp.einsum("bsd,ed->bse", x, w_node) + b_node, 0.0)
    scores = jnp.einsum("bse,bte->bst", node, node)
    p = jax.nn.softmax(scores, axis=-1)
    return jnp.einsum("bst,bte->bse", p, node)


if __name__ == "__main__":
    B, S, D = 8, 8, 32
    key = jax.random.PRNGKey(0)
    kx, kw, kb = jax.random.split(key, 3)

    x = jax.random.normal(kx, (B, S, D), dtype=jnp.float32)
    # Deterministic nn.Linear(d_model, d_model)-shaped params; scaled so the
    # softmax is neither uniform nor fully saturated (well-conditioned test).
    w_node = jax.random.normal(kw, (D, D), dtype=jnp.float32) * (0.3 / jnp.sqrt(D))
    b_node = jax.random.normal(kb, (D,), dtype=jnp.float32) * 0.01

    out = causal_graph_encoder(x, w_node, b_node)
    out = jax.block_until_ready(out)

    ref = _reference(x, w_node, b_node)
    assert out.shape == (B, S, D)
    # Softmax uses exact division; the tolerance only has to cover MXU-pass vs
    # XLA-dot f32 contraction-precision differences.
    max_diff = float(jnp.max(jnp.abs(out - ref)))
    assert jnp.allclose(out, ref, atol=1e-2, rtol=1e-2), max_diff
    print("KERNEL_OK")
</pallas_src>

<mosaic_0001>
module attributes {stable_mosaic.version = 11 : i64} {
  func.func @_causal_graph_kernel(%arg0: i32, %arg1: memref<8x8x32xf32, #tpu.memory_space<vmem>>, %arg2: memref<32x32xf32, #tpu.memory_space<vmem>>, %arg3: memref<1x32xf32, #tpu.memory_space<vmem>>, %arg4: memref<8x256xf32, #tpu.memory_space<vmem>>) attributes {dimension_semantics = [#tpu.dimension_semantics<parallel>], iteration_bounds = array<i64: 1>, scalar_prefetch = 0 : i64, scratch_operands = 0 : i64, tpu.core_type = #tpu.core_type<tc>, window_params = [{transform_indices = @transform_0, window_bounds = array<i64: 8, 8, 32>}, {pipeline_mode = #tpu.pipeline_mode<synchronous>, transform_indices = @transform_1, window_bounds = array<i64: 32, 32>}, {pipeline_mode = #tpu.pipeline_mode<synchronous>, transform_indices = @transform_2, window_bounds = array<i64: 1, 32>}, {transform_indices = @transform_3, window_bounds = array<i64: 8, 256>}]} {
    %c0 = arith.constant 0 : index
    %c0_0 = arith.constant 0 : index
    %c0_1 = arith.constant 0 : index
    %0 = vector.load %arg1[%c0, %c0_0, %c0_1] : memref<8x8x32xf32, #tpu.memory_space<vmem>>, vector<8x8x32xf32>
    %c0_2 = arith.constant 0 : index
    %c0_3 = arith.constant 0 : index
    %1 = vector.load %arg2[%c0_2, %c0_3] : memref<32x32xf32, #tpu.memory_space<vmem>>, vector<32x32xf32>
    %c0_4 = arith.constant 0 : index
    %c0_5 = arith.constant 0 : index
    %2 = vector.load %arg3[%c0_4, %c0_5] : memref<1x32xf32, #tpu.memory_space<vmem>>, vector<1x32xf32>
    %3 = vector.shape_cast %0 : vector<8x8x32xf32> to vector<64x32xf32>
    %cst = arith.constant dense<0.000000e+00> : vector<64x32xf32>
    %4 = tpu.matmul %3, %1, %cst {dimension_numbers = #tpu.dot_dimension_numbers<[1], [0], [0], [1], [0, 0, 1, 1], [], []>} : vector<64x32xf32>, vector<32x32xf32>, vector<64x32xf32> -> vector<64x32xf32>
    %5 = vector.broadcast %2 : vector<1x32xf32> to vector<64x32xf32>
    %6 = arith.addf %4, %5 : vector<64x32xf32>
    %cst_6 = arith.constant 0.000000e+00 : f32
    %7 = vector.broadcast %cst_6 : f32 to vector<64x32xf32>
    %8 = arith.maximumf %6, %7 : vector<64x32xf32>
    %9 = vector.shape_cast %8 : vector<64x32xf32> to vector<8x8x32xf32>
    "tpu.trace_start"() <{level = 10 : i32, message = "bsd,btd->bst"}> : () -> ()
    %cst_7 = arith.constant dense<0.000000e+00> : vector<8x8x8xf32>
    %10 = tpu.matmul %9, %9, %cst_7 {dimension_numbers = #tpu.dot_dimension_numbers<[2], [2], [1], [1], [0, 0, 0, 1, 1, 1], [0], [0]>} : vector<8x8x32xf32>, vector<8x8x32xf32>, vector<8x8x8xf32> -> vector<8x8x8xf32>
    "tpu.trace_stop"() : () -> ()
    %cst_8 = arith.constant dense<0xFF800000> : vector<8x8xf32>
    %11 = vector.multi_reduction <maximumf>, %10, %cst_8 [2] : vector<8x8x8xf32> to vector<8x8xf32>
    %12 = vector.shape_cast %11 : vector<8x8xf32> to vector<8x8x1xf32>
    %13 = vector.broadcast %12 : vector<8x8x1xf32> to vector<8x8x8xf32>
    %14 = arith.subf %10, %13 : vector<8x8x8xf32>
    %15 = math.exp %14 : vector<8x8x8xf32>
    %cst_9 = arith.constant dense<0.000000e+00> : vector<8x8xf32>
    %16 = vector.multi_reduction <add>, %15, %cst_9 [2] : vector<8x8x8xf32> to vector<8x8xf32>
    %17 = vector.shape_cast %16 : vector<8x8xf32> to vector<8x8x1xf32>
    %18 = vector.broadcast %17 : vector<8x8x1xf32> to vector<8x8x8xf32>
    %19 = arith.divf %15, %18 : vector<8x8x8xf32>
    "tpu.trace_start"() <{level = 10 : i32, message = "bst,btd->bsd"}> : () -> ()
    %cst_10 = arith.constant dense<0.000000e+00> : vector<8x8x32xf32>
    %20 = tpu.matmul %19, %9, %cst_10 {dimension_numbers = #tpu.dot_dimension_numbers<[2], [1], [1], [2], [0, 0, 0, 1, 1, 2], [0], [0]>} : vector<8x8x8xf32>, vector<8x8x32xf32>, vector<8x8x32xf32> -> vector<8x8x32xf32>
    "tpu.trace_stop"() : () -> ()
    %21 = vector.shape_cast %20 : vector<8x8x32xf32> to vector<8x256xf32>
    %c0_11 = arith.constant 0 : index
    %c0_12 = arith.constant 0 : index
    %22 = vector.load %arg4[%c0_11, %c0_12] : memref<8x256xf32, #tpu.memory_space<vmem>>, vector<8x256xf32>
    tpu.vector_store %arg4[%c0_11, %c0_12], %21 {strides = array<i32>} : memref<8x256xf32, #tpu.memory_space<vmem>>, vector<8x256xf32>,
    return
  }
  func.func @transform_0(%arg0: i32) -> (i32, i32, i32) {
    %c0_i32 = arith.constant 0 : i32
    %c0_i32_0 = arith.constant 0 : i32
    %c0_i32_1 = arith.constant 0 : i32
    return %arg0, %c0_i32, %c0_i32_0 : i32, i32, i32
  }
  func.func @transform_1(%arg0: i32) -> (i32, i32) {
    %c0_i32 = arith.constant 0 : i32
    %c0_i32_0 = arith.constant 0 : i32
    %c0_i32_1 = arith.constant 0 : i32
    return %c0_i32, %c0_i32_0 : i32, i32
  }
  func.func @transform_2(%arg0: i32) -> (i32, i32) {
    %c0_i32 = arith.constant 0 : i32
    %c0_i32_0 = arith.constant 0 : i32
    %c0_i32_1 = arith.constant 0 : i32
    return %c0_i32, %c0_i32_0 : i32, i32
  }
  func.func @transform_3(%arg0: i32) -> (i32, i32) {
    %c0_i32 = arith.constant 0 : i32
    %c0_i32_0 = arith.constant 0 : i32
    return %arg0, %c0_i32 : i32, i32
  }
}

</mosaic_0001>

<bundles_post_ra>
// kernel: tpu_custom_call.1
= control target key start
LH: loop header
LB: loop body
LE: loop exit
PB: predicated region body
PF: predicated region fallthrough
CT: control target
= control target key end

     0   :  { %8 = vsyncpa [#allocation3], 0  ;;  %s2143_s0 = inlined_call_operand.hbm [shape: f32[8,8,32], index: 0, kind: input, shape index: {}]   ;;  %s2144_s1 = inlined_call_operand.hbm [shape: f32[32,32], index: 1, kind: input, shape index: {}]   ;;  %s2145_s2 = inlined_call_operand.vmem [shape: f32[1,32], index: 2, kind: input, shape index: {}]   ;;  %s2146_s3 = inlined_call_operand.hbm [shape: f32[8,256], index: 3, kind: output, shape index: {}]  }
   0x1   :  { %9 = vsyncpa [#allocation6], 0 }
   0x2   :  { %10 = vsyncpa [#allocation4], 0  ;;  %s1944_s12 = smov [#allocation2]   ;;  %s1872_s16 = scalar_lea.hbm %s2143_s0, 1024 }
   0x3   :  { %s16_s13 = sshll.u32 %s1944_s12, 4  ;;  %p1873_p0 = scmp.ne.s32.totalorder %s2143_s0, %s1872_s16  ;;  %s17_s13 = int_to_ptr.vmem [resolvable:$true] %s16_s13 }
   0x4   :  { %p1876_p1 = scmp.lt.u32.totalorder %s1872_s16, %s2143_s0 }
   0x6   :  { %p1878_p2 = pnand %p1876_p1, %p1873_p0 }
   0x8   :  { %1881 = shalt.err (!%p1878_p2)
}
   0x9   :  { %s1882_s21 = scalar_lea.vmem %s17_s13, 1024  ;;  %p1887_p4 = scmp.lt.s32.totalorder %s17_s13, %s17_s13 }
   0xa   :  { %p1883_p3 = scmp.ne.s32.totalorder %s17_s13, %s1882_s21  ;;  %p1888_p5 = scmp.lt.s32.totalorder %s1882_s21, %s1882_s21 }
   0xc   :  { %p1889_p6 = por %p1888_p5, %p1887_p4 }
   0xe   :  { %p1890_p7 = pnand %p1889_p6, %p1883_p3 }
  0x10   :  { %1893 = shalt.err (!%p1890_p7)
}
  0x11   :  { %s1945_s22 = smov 128   ;;  %s1946_s23 = smov 8  }
  0x12   :  { %22 = dma.hbm_to_vmem [thread:$0]  %s2143_s0, 1024, %s17_s13, [#allocation3], %s1945_s22, %s1945_s22, %s1946_s23  }
  0x13   :  { %s1947_s26 = smov [#allocation5]   ;;  %s1894_s30 = scalar_lea.hbm %s2144_s1, 512 }
  0x14   :  { %s28_s27 = sshll.u32 %s1947_s26, 4  ;;  %p1895_p8 = scmp.ne.s32.totalorder %s2144_s1, %s1894_s30  ;;  %s29_s27 = int_to_ptr.vmem [resolvable:$true] %s28_s27 }
  0x15   :  { %p1898_p9 = scmp.lt.u32.totalorder %s1894_s30, %s2144_s1 }
  0x17   :  { %p1900_p10 = pnand %p1898_p9, %p1895_p8 }
  0x19   :  { %1903 = shalt.err (!%p1900_p10)
}
  0x1a   :  { %s1904_s8 = scalar_lea.vmem %s29_s27, 512  ;;  %p1909_p12 = scmp.lt.s32.totalorder %s29_s27, %s29_s27 }
  0x1b   :  { %p1905_p11 = scmp.ne.s32.totalorder %s29_s27, %s1904_s8  ;;  %p1910_p13 = scmp.lt.s32.totalorder %s1904_s8, %s1904_s8 }
  0x1d   :  { %p1911_p0 = por %p1910_p13, %p1909_p12 }
  0x1f   :  { %p1912_p1 = pnand %p1911_p0, %p1905_p11 }
  0x21   :  { %1915 = shalt.err (!%p1912_p1)
}
  0x22   :  { %34 = dma.hbm_to_vmem [thread:$0]  %s2144_s1, 512, %s29_s27, [#allocation6], %s1945_s22, %s1945_s22, %s1946_s23  }
  0x23   :  { %1938 = dma.done.wait [#allocation3], 1024  }
  0x24   :  { %1939 = vsyncadd [#allocation3], 4294966272 }
  0x25   :  { %1940 = dma.done.wait [#allocation6], 512  }
  0x26   :  { %1941 = vsyncadd [#allocation6], 4294966784  ;;  %vm62_vm0 = vcmask 261120   ;;  %v51_v0 = vld [vmem:[#allocation5] sm:$0xff]  ;;  %v52_v1 = vld [vmem:[#allocation5 + $0x8] sm:$0xff]  ;;  %v1948_v14 = vmov 0.0  }
  0x27   :  { %v53_v2 = vld [vmem:[#allocation5 + $0x10] sm:$0xff]  ;;  %v1820_v3 = vpack.c.bf16 %v52_v1, %v51_v0  ;;  %v54_v4 = vld [vmem:[#allocation5 + $0x18] sm:$0xff]  ;;  %v43_v5 = vld [vmem:[#allocation2] sm:$0xff]  ;;  %1740 = vmatprep.subr.mxu1 %v1948_v14  ;;  %vm1949_vm1 = vmmov 0   ;;  %vm784_vm2 = vcmask 64512   ;;  %s1953_s11 = smov 64  }
  0x28   :  { %v1824_v6 = vpack.c.bf16 %v54_v4, %v53_v2  ;;  %1728 = vmatprep.mubr.msk.f32.mxu0 %vm62_vm0, %v43_v5  ;;  %v44_v7 = vld [vmem:[#allocation2 + $0x8] sm:$0xff]  ;;  %v45_v8 = vld [vmem:[#allocation2 + $0x10] sm:$0xff]  ;;  %v46_v9 = vld [vmem:[#allocation2 + $0x18] sm:$0xff]  ;;  %1742 = vmatprep.mubr.msk.f32.mxu1 %vm1949_vm1, %v1948_v14  ;;  %s1954_s12 = smov 96   ;;  %vm1618_vm3 = vcmask 523264   ;;  %vm1620_vm4 = vcmask 785408  }
  0x29   :  { %1821 = vmatprep.subr.bf16.mxu0 %v1820_v3  ;;  %v47_v10 = vld [vmem:[#allocation2 + $0x20] sm:$0xff]  ;;  %v48_v11 = vld [vmem:[#allocation2 + $0x28] sm:$0xff]  ;;  %v49_v12 = vld [vmem:[#allocation2 + $0x30] sm:$0xff]  ;;  %s1955_s13 = smov [#allocation7]  }
  0x2a   :  { %1823 = vmatpush3.bf16.msra.mxu0 %v1820_v3  ;;  %v50_v13 = vld [vmem:[#allocation2 + $0x38] sm:$0xff]  ;;  %v1643_v15 = vld [vmem:[%s2145_s2] ss:$0 sm:$0xff]  ;;  %s1952_s2 = smov 32   ;;  %s1633_s14 = sshll.u32 %s1955_s13, 4  ;;  %s1634_s14 = int_to_ptr.vmem [resolvable:$true] %s1633_s14 }
  0x2b   :  { %1825 = vmatprep.subr.bf16.mxu0 %v1824_v6  ;;  %s1916_s15 = scalar_lea.vmem %s1634_s14, 256  ;;  %p1921_p3 = scmp.lt.s32.totalorder %s1634_s14, %s1634_s14 }
  0x2c   :  { %p1917_p2 = scmp.ne.s32.totalorder %s1634_s14, %s1916_s15  ;;  %p1922_p4 = scmp.lt.s32.totalorder %s1916_s15, %s1916_s15 }
  0x2e   :  { %1827 = vmatpush3.bf16.msra.mxu0 %v1824_v6  ;;  %p1923_p5 = por %p1922_p4, %p1921_p3 }
  0x2f   :  { %1765 = vmatprep.subr.mxu0 %v1948_v14 }
  0x30   :  { %p1924_p6 = pnand %p1923_p5, %p1917_p2 }
  0x31   :  { %1729 = vmatmul.mubr.msk.f32.vlgmr.msra.gmra.mrb[0].mxu0 %vm62_vm0, %v44_v7 }
  0x32   :  { %1731 = vmatprep.mubr.msk.f32.mxu0 %vm62_vm0, %v45_v8 }
  0x35   :  { %1732 = vmatmul.mubr.msk.f32.gmra.mrb[2].mxu0 %vm62_vm0, %v46_v9 }
  0x36   :  { %1734 = vmatprep.mubr.msk.f32.mxu0 %vm62_vm0, %v47_v10 }
  0x39   :  { %1735 = vmatmul.mubr.msk.f32.gmra.mrb[4].mxu0 %vm62_vm0, %v48_v11 }
  0x3a   :  { %1737 = vmatprep.mubr.msk.f32.mxu0 %vm62_vm0, %v49_v12 }
  0x3d   :  { %1738 = vmatmul.mubr.msk.f32.gmra.mrb[6].mxu0 %vm62_vm0, %v50_v13 }
  0x3e   :  { %1767 = vmatprep.mubr.msk.f32.mxu0 %vm1949_vm1, %v1948_v14 }
 0x104   :  { %v1730_v16 = vpop.f32.mrb[0].mxu0 }
 0x105   :  { %v153_v17 = vpop.f32.mrb[1].mxu0  ;;  %v159_v19 = vadd.f32 %v1730_v16, %v1643_v15 }
 0x106   :  { %v154_v18 = vadd.f32 %v1643_v15, %v153_v17 }
 0x107   :  { %v193_v24 = vmax.f32 %v159_v19, 0.0 }
 0x108   :  { %v192_v20 = vmax.f32 %v154_v18, 0.0  ;;  %v1733_v21 = vpop.f32.mrb[2].mxu0 }
 0x109   :  { %v163_v22 = vpop.f32.mrb[3].mxu0  ;;  %v169_v30 = vadd.f32 %v1733_v21, %v1643_v15 }
 0x10a   :  { %v164_v23 = vadd.f32 %v1643_v15, %v163_v22  ;;  %1741 = vmatpush3.xpose.msk.msra.mxu1 %vm62_vm0, %v192_v20 }
 0x10b   :  { %1745 = vmatprep.subr.mxu1 %v1948_v14  ;;  %v2039_v36 = vmax.f32 %v169_v30, 0.0 }
 0x10c   :  { %v1736_v25 = vpop.f32.mrb[4].mxu0  ;;  %v2020_v28 = vmax.f32 %v164_v23, 0.0 }
 0x10d   :  { %v179_v26 = vadd.f32 %v1736_v25, %v1643_v15  ;;  %v173_v27 = vpop.f32.mrb[5].mxu0  ;;  %1743 = vmatmul.mubr.msk.f32.vlgmr.msra.gmra.mrb[0].mxu1 %vm62_vm0, %v192_v20 }
 0x10e   :  { %1746 = vmatpush3.xpose.msk.msra.mxu1 %vm62_vm0, %v193_v24  ;;  %1747 = vmatprep.mubr.msk.f32.mxu1 %vm1949_vm1, %v1948_v14  ;;  %v174_v34 = vadd.f32 %v1643_v15, %v173_v27 }
 0x10f   :  { %v2025_v29 = vmax.f32 %v179_v26, 0.0  ;;  %1750 = vmatprep.subr.mxu1 %v1948_v14 }
 0x110   :  { %v1739_v31 = vpop.f32.mrb[6].mxu0  ;;  %v2047_v37 = vmax.f32 %v174_v34, 0.0 }
 0x111   :  { %v189_v32 = vadd.f32 %v1739_v31, %v1643_v15  ;;  %1748 = vmatmul.mubr.msk.f32.vlgmr.msra.gmra.mrb[2].mxu1 %vm62_vm0, %v193_v24  ;;  %1766 = vmatpush3.xpose.msk.msra.mxu0 %vm62_vm0, %v2025_v29  ;;  %v183_v33 = vpop.f32.mrb[7].mxu0 }
 0x112   :  { %1751 = vmatpush3.xpose.msk.msra.mxu1 %vm62_vm0, %v2020_v28  ;;  %1752 = vmatprep.mubr.msk.f32.mxu1 %vm1949_vm1, %v1948_v14  ;;  %v184_v38 = vadd.f32 %v1643_v15, %v183_v33 }
 0x113   :  { %v2035_v35 = vmax.f32 %v189_v32, 0.0  ;;  %1775 = vmatprep.subr.mxu0 %v1948_v14  ;;  %1755 = vmatprep.subr.mxu1 %v1948_v14 }
 0x114   :  { %1768 = vmatmul.mubr.msk.f32.vlgmr.msra.gmra.mrb[8].mxu0 %vm62_vm0, %v2025_v29  ;;  %v2061_v39 = vmax.f32 %v184_v38, 0.0 }
 0x115   :  { %1753 = vmatmul.mubr.msk.f32.vlgmr.msra.gmra.mrb[4].mxu1 %vm62_vm0, %v2020_v28  ;;  %1776 = vmatpush3.xpose.msk.msra.mxu0 %vm62_vm0, %v2035_v35 }
 0x116   :  { %1756 = vmatpush3.xpose.msk.msra.mxu1 %vm62_vm0, %v2039_v36  ;;  %1757 = vmatprep.mubr.msk.f32.mxu1 %vm1949_vm1, %v1948_v14 }
 0x117   :  { %1777 = vmatprep.mubr.msk.f32.mxu0 %vm1949_vm1, %v1948_v14  ;;  %1785 = vmatprep.subr.mxu0 %v1948_v14 }
 0x118   :  { %1760 = vmatprep.subr.mxu1 %v1948_v14  ;;  %1778 = vmatmul.mubr.msk.f32.vlgmr.msra.gmra.mrb[10].mxu0 %vm62_vm0, %v2035_v35 }
 0x119   :  { %1758 = vmatmul.mubr.msk.f32.vlgmr.msra.gmra.mrb[6].mxu1 %vm62_vm0, %v2039_v36  ;;  %1786 = vmatpush3.msra.mxu0 %v193_v24 }
 0x11a   :  { %1761 = vmatpush3.xpose.msk.msra.mxu1 %vm62_vm0, %v2047_v37  ;;  %1762 = vmatprep.mubr.msk.f32.mxu1 %vm1949_vm1, %v1948_v14 }
 0x11b   :  { %1770 = vmatprep.subr.mxu1 %v1948_v14  ;;  %1787 = vmatprep.mubr.msk.f32.mxu0 %vm1949_vm1, %v1948_v14 }
 0x11c   :  { %1795 = vmatprep.subr.mxu0 %v1948_v14 }
 0x11d   :  { %1763 = vmatmul.mubr.msk.f32.vlgmr.msra.gmra.mrb[8].mxu1 %vm62_vm0, %v2047_v37 }
 0x11e   :  { %1771 = vmatpush3.xpose.msk.msra.mxu1 %vm62_vm0, %v2061_v39  ;;  %1772 = vmatprep.mubr.msk.f32.mxu1 %vm1949_vm1, %v1948_v14 }
 0x11f   :  { %1780 = vmatprep.subr.mxu1 %v1948_v14 }
 0x121   :  { %1773 = vmatmul.mubr.msk.f32.vlgmr.msra.gmra.mrb[10].mxu1 %vm62_vm0, %v2061_v39 }
 0x122   :  { %1781 = vmatpush3.msra.mxu1 %v192_v20  ;;  %1782 = vmatprep.mubr.msk.f32.mxu1 %vm1949_vm1, %v1948_v14 }
 0x123   :  { %1790 = vmatprep.subr.mxu1 %v1948_v14 }
 0x1e0   :  { %v269_v40 = vpop.f32.mrb[0].mxu1 }
 0x1e1   :  { %v1744_v41 = vpop.f32.mrb[1].mxu1  ;;  %v785_v42 = vsel %vm784_vm2, %v269_v40, -inf }
 0x1e2   :  { %786 = vmax.xlane.f32.xlu0 %v785_v42 }
 0x1e4   :  { %v342_v43 = vpop.f32.mrb[2].mxu1 }
 0x1e5   :  { %v1749_v44 = vpop.f32.mrb[3].mxu1  ;;  %v788_v45 = vsel %vm784_vm2, %v342_v43, -inf }
 0x1e6   :  { %789 = vmax.xlane.f32.xlu0 %v788_v45 }
 0x1e7   :  { %v634_v46 = vpop.f32.mrb[8].mxu0 }
 0x1e8   :  { %v415_v47 = vpop.f32.mrb[4].mxu1  ;;  %v1769_v48 = vpop.f32.mrb[9].mxu0  ;;  %v800_v58 = vsel %vm784_vm2, %v634_v46, -inf }
 0x1e9   :  { %v1754_v49 = vpop.f32.mrb[5].mxu1  ;;  %v791_v50 = vsel %vm784_vm2, %v415_v47, -inf }
 0x1ea   :  { %792 = vmax.xlane.f32.xlu1 %v791_v50 }
 0x1eb   :  { %v780_v51 = vpop.f32.mrb[10].mxu0 }
 0x1ec   :  { %v488_v52 = vpop.f32.mrb[6].mxu1  ;;  %v1779_v53 = vpop.f32.mrb[11].mxu0  ;;  %v806_v62 = vsel %vm784_vm2, %v780_v51, -inf }
 0x1ed   :  { %v1759_v54 = vpop.f32.mrb[7].mxu1  ;;  %v794_v55 = vsel %vm784_vm2, %v488_v52, -inf }
 0x1ee   :  { %795 = vmax.xlane.f32.xlu1 %v794_v55 }
 0x1f0   :  { %v561_v56 = vpop.f32.mrb[8].mxu1 }
 0x1f1   :  { %v1764_v57 = vpop.f32.mrb[9].mxu1  ;;  %v797_v59 = vsel %vm784_vm2, %v561_v56, -inf }
 0x1f2   :  { %801 = vmax.xlane.f32.xlu1 %v800_v58  ;;  %798 = vmax.xlane.f32.xlu0 %v797_v59 }
 0x1f4   :  { %v707_v60 = vpop.f32.mrb[10].mxu1 }
 0x1f5   :  { %v1774_v61 = vpop.f32.mrb[11].mxu1  ;;  %v803_v63 = vsel %vm784_vm2, %v707_v60, -inf }
 0x1f6   :  { %807 = vmax.xlane.f32.xlu1 %v806_v62  ;;  %804 = vmax.xlane.f32.xlu0 %v803_v63 }
 0x26f   :  { %v787_v0 = vpop.xlane.xlu0 %786 }
 0x270   :  { %v809_v1 = vsub.f32 %v269_v40, %v787_v0 }
 0x272   :  { %v817_v2 = vmul.f32 1.442695, %v809_v1 }
 0x273   :  { %v790_v3 = vpop.xlane.xlu0 %789 }
 0x274   :  { %1840 = vpow2.f32 %v817_v2  ;;  %v810_v4 = vsub.f32 %v342_v43, %v790_v3 }
 0x276   :  { %v819_v5 = vmul.f32 1.442695, %v810_v4 }
 0x277   :  { %v793_v6 = vpop.xlane.xlu1 %792 }
 0x278   :  { %1842 = vpow2.f32 %v819_v5  ;;  %v811_v7 = vsub.f32 %v415_v47, %v793_v6  ;;  %v1950_v5 = vmov 1983009808  }
 0x279   :  { %v1460_v6 = vunpack.c.l.s4 %v1950_v5 }
 0x27a   :  { %v821_v8 = vmul.f32 1.442695, %v811_v7 }
 0x27b   :  { %v796_v9 = vpop.xlane.xlu1 %795 }
 0x27c   :  { %1844 = vpow2.f32 %v821_v8  ;;  %v812_v10 = vsub.f32 %v488_v52, %v796_v9  ;;  %v1461_v9 = vunpack.c.0.s8 %v1460_v6 }
 0x27e   :  { %v1841_v11 = vpop.eup %1840  ;;  %v823_v12 = vmul.f32 1.442695, %v812_v10 }
 0x27f   :  { %v802_v13 = vpop.xlane.xlu1 %801  ;;  %v799_v15 = vpop.xlane.xlu0 %798  ;;  %v833_v16 = vsel %vm784_vm2, %v1841_v11, 0.0 }
 0x280   :  { %1846 = vpow2.f32 %v823_v12  ;;  %v814_v17 = vsub.f32 %v634_v46, %v802_v13  ;;  %v813_v18 = vsub.f32 %v561_v56, %v799_v15  ;;  %834 = vadd.xlane.f32.xlu0 %v833_v16 }
 0x282   :  { %v1843_v19 = vpop.eup %1842  ;;  %v827_v20 = vmul.f32 1.442695, %v814_v17  ;;  %v825_v21 = vmul.f32 1.442695, %v813_v18 }
 0x283   :  { %v808_v22 = vpop.xlane.xlu1 %807  ;;  %v805_v23 = vpop.xlane.xlu0 %804  ;;  %v836_v24 = vsel %vm784_vm2, %v1843_v19, 0.0 }
 0x284   :  { %1848 = vpow2.f32 %v827_v20  ;;  %v816_v25 = vsub.f32 %v780_v51, %v808_v22  ;;  %v815_v26 = vsub.f32 %v707_v60, %v805_v23  ;;  %837 = vadd.xlane.f32.xlu1 %v836_v24 }
 0x285   :  { %1850 = vpow2.f32 %v825_v21 }
 0x286   :  { %v1845_v27 = vpop.eup %1844  ;;  %v831_v30 = vmul.f32 1.442695, %v816_v25  ;;  %v829_v31 = vmul.f32 1.442695, %v815_v26 }
 0x287   :  { %v839_v32 = vsel %vm784_vm2, %v1845_v27, 0.0 }
 0x288   :  { %1852 = vpow2.f32 %v831_v30  ;;  %840 = vadd.xlane.f32.xlu0 %v839_v32 }
 0x289   :  { %1854 = vpow2.f32 %v829_v31 }
 0x28a   :  { %v1847_v33 = vpop.eup %1846 }
 0x28b   :  { %v842_v34 = vsel %vm784_vm2, %v1847_v33, 0.0 }
 0x28c   :  { %843 = vadd.xlane.f32.xlu1 %v842_v34 }
 0x28e   :  { %v1849_v38 = vpop.eup %1848 }
 0x28f   :  { %v1851_v40 = vpop.eup %1850  ;;  %v848_v41 = vsel %vm784_vm2, %v1849_v38, 0.0 }
 0x290   :  { %849 = vadd.xlane.f32.xlu1 %v848_v41  ;;  %v845_v42 = vsel %vm784_vm2, %v1851_v40, 0.0 }
 0x291   :  { %846 = vadd.xlane.f32.xlu0 %v845_v42 }
 0x292   :  { %v1853_v43 = vpop.eup %1852 }
 0x293   :  { %v1855_v44 = vpop.eup %1854  ;;  %v854_v45 = vsel %vm784_vm2, %v1853_v43, 0.0 }
 0x294   :  { %855 = vadd.xlane.f32.xlu1 %v854_v45  ;;  %v851_v46 = vsel %vm784_vm2, %v1855_v44, 0.0 }
 0x295   :  { %852 = vadd.xlane.f32.xlu0 %v851_v46 }
 0x30d   :  { %v835_v47 = vpop.xlane.xlu0 %834 }
 0x30e   :  { %1856 = vrcp.f32 %v835_v47 }
 0x311   :  { %v838_v48 = vpop.xlane.xlu1 %837 }
 0x312   :  { %1858 = vrcp.f32 %v838_v48 }
 0x315   :  { %v841_v49 = vpop.xlane.xlu0 %840 }
 0x316   :  { %1860 = vrcp.f32 %v841_v49 }
 0x318   :  { %v1857_v50 = vpop.eup %1856 }
 0x319   :  { %v858_v51 = vmul.f32 %v1857_v50, %v1841_v11  ;;  %v844_v52 = vpop.xlane.xlu1 %843 }
 0x31a   :  { %1862 = vrcp.f32 %v844_v52 }
 0x31b   :  { %1783 = vmatmul.mubr.msk.f32.vlgmr.msra.gmra.mrb[12].mxu1 %vm784_vm2, %v858_v51 }
 0x31c   :  { %v1859_v53 = vpop.eup %1858  ;;  %1791 = vmatpush3.msra.mxu1 %v2020_v28  ;;  %1792 = vmatprep.mubr.msk.f32.mxu1 %vm1949_vm1, %v1948_v14 }
 0x31d   :  { %v860_v54 = vmul.f32 %v1859_v53, %v1843_v19  ;;  %v850_v55 = vpop.xlane.xlu1 %849  ;;  %1800 = vmatprep.subr.mxu1 %v1948_v14  ;;  %v1951_v19 = vmov 1934713408  }
 0x31e   :  { %1864 = vrcp.f32 %v850_v55  ;;  %v847_v56 = vpop.xlane.xlu0 %846  ;;  %v1524_v20 = vunpack.c.l.s4 %v1951_v19 }
 0x31f   :  { %1866 = vrcp.f32 %v847_v56  ;;  %1788 = vmatmul.mubr.msk.f32.vlgmr.msra.gmra.mrb[12].mxu0 %vm784_vm2, %v860_v54 }
 0x320   :  { %v1861_v57 = vpop.eup %1860  ;;  %1796 = vmatpush3.msra.mxu0 %v2039_v36  ;;  %1797 = vmatprep.mubr.msk.f32.mxu0 %vm1949_vm1, %v1948_v14 }
 0x321   :  { %v862_v58 = vmul.f32 %v1861_v57, %v1845_v27  ;;  %v856_v28 = vpop.xlane.xlu1 %855  ;;  %1805 = vmatprep.subr.mxu0 %v1948_v14 }
 0x322   :  { %1868 = vrcp.f32 %v856_v28  ;;  %v853_v59 = vpop.xlane.xlu0 %852 }
 0x323   :  { %1870 = vrcp.f32 %v853_v59  ;;  %1793 = vmatmul.mubr.msk.f32.vlgmr.msra.gmra.mrb[14].mxu1 %vm784_vm2, %v862_v58 }
 0x324   :  { %v1863_v60 = vpop.eup %1862  ;;  %1801 = vmatpush3.msra.mxu1 %v2047_v37  ;;  %1802 = vmatprep.mubr.msk.f32.mxu1 %vm1949_vm1, %v1948_v14 }
 0x325   :  { %v864_v61 = vmul.f32 %v1863_v60, %v1847_v33  ;;  %1810 = vmatprep.subr.mxu1 %v1948_v14 }
 0x327   :  { %1798 = vmatmul.mubr.msk.f32.vlgmr.msra.gmra.mrb[14].mxu0 %vm784_vm2, %v864_v61 }
 0x328   :  { %v1865_v36 = vpop.eup %1864  ;;  %1806 = vmatpush3.msra.mxu0 %v2025_v29  ;;  %1807 = vmatprep.mubr.msk.f32.mxu0 %vm1949_vm1, %v1948_v14 }
 0x329   :  { %v1867_v62 = vpop.eup %1866  ;;  %v868_v63 = vmul.f32 %v1865_v36, %v1849_v38  ;;  %1815 = vmatprep.subr.mxu0 %v1948_v14  ;;  %v1525_v38 = vunpack.c.0.s8 %v1524_v20 }
 0x32a   :  { %v866_v0 = vmul.f32 %v1867_v62, %v1851_v40 }
 0x32b   :  { %1808 = vmatmul.mubr.msk.f32.vlgmr.msra.gmra.mrb[16].mxu0 %vm784_vm2, %v868_v63 }
 0x32c   :  { %v1869_v37 = vpop.eup %1868  ;;  %1803 = vmatmul.mubr.msk.f32.vlgmr.msra.gmra.mrb[16].mxu1 %vm784_vm2, %v866_v0  ;;  %1816 = vmatpush3.msra.mxu0 %v2035_v35  ;;  %v1462_v35 = vlaneseq }
 0x32d   :  { %v1871_v1 = vpop.eup %1870  ;;  %v872_v2 = vmul.f32 %v1869_v37, %v1853_v43  ;;  %1811 = vmatpush3.msra.mxu1 %v2061_v39  ;;  %1812 = vmatprep.mubr.msk.f32.mxu1 %vm1949_vm1, %v1948_v14 }
 0x32e   :  { %v870_v29 = vmul.f32 %v1871_v1, %v1855_v44  ;;  %1817 = vmatprep.mubr.msk.f32.mxu0 %vm1949_vm1, %v1948_v14  ;;  %v1463_v39 = vshrl.u32 %v1462_v35, 7 }
 0x32f   :  { %1818 = vmatmul.mubr.msk.f32.vlgmr.msra.gmra.mrb[18].mxu0 %vm784_vm2, %v872_v2 }
 0x330   :  { %1813 = vmatmul.mubr.msk.f32.vlgmr.msra.gmra.mrb[18].mxu1 %vm784_vm2, %v870_v29  ;;  %v1464_v15 = vsub.s32 %v1461_v9, %v1463_v39  ;;  %v1528_v50 = vsub.s32 %v1525_v38, %v1463_v39 }
 0x3ee   :  { %v942_v3 = vpop.f32.mrb[12].mxu1 }
 0x3ef   :  { %v1784_v4 = vpop.f32.mrb[13].mxu1 }
 0x3f2   :  { %v1015_v7 = vpop.f32.mrb[12].mxu0 }
 0x3f3   :  { %v1789_v8 = vpop.f32.mrb[13].mxu0 }
 0x3f6   :  { %v1088_v10 = vpop.f32.mrb[14].mxu1 }
 0x3f7   :  { %v1457_v11 = vcombine.low %v942_v3, %v1088_v10  ;;  %v1458_v12 = vcombine.high %v942_v3, %v1088_v10  ;;  %v1794_v13 = vpop.f32.mrb[15].mxu1 }
 0x3f9   :  { %v1465_v21 = vrot.slane %v1457_v11, %v1464_v15  ;;  %v1472_v22 = vrot.slane %v1458_v12, %v1464_v15 }
 0x3fa   :  { %v1161_v16 = vpop.f32.mrb[14].mxu0 }
 0x3fb   :  { %v1473_v14 = vcombine.low %v1015_v7, %v1161_v16  ;;  %v1474_v17 = vcombine.high %v1015_v7, %v1161_v16  ;;  %v1799_v18 = vpop.f32.mrb[15].mxu0 }
 0x3fd   :  { %v1481_v23 = vrot.slane %v1473_v14, %v1464_v15  ;;  %v1488_v24 = vrot.slane %v1474_v17, %v1464_v15 }
 0x3fe   :  { %v1307_v25 = vpop.f32.mrb[16].mxu0 }
 0x3ff   :  { %v1521_v26 = vcombine.low %v1465_v21, %v1481_v23  ;;  %v1522_v27 = vcombine.high %v1465_v21, %v1481_v23  ;;  %v1537_v30 = vcombine.low %v1472_v22, %v1488_v24  ;;  %v1538_v31 = vcombine.high %v1472_v22, %v1488_v24  ;;  %v1234_v32 = vpop.f32.mrb[16].mxu1  ;;  %v1809_v33 = vpop.f32.mrb[17].mxu0 }
 0x400   :  { %v1804_v34 = vpop.f32.mrb[17].mxu1 }
 0x401   :  { %v1545_v57 = vrot.slane %v1537_v30, %v1528_v50  ;;  %v1529_v58 = vrot.slane %v1521_v26, %v1528_v50  ;;  %v1536_v28 = vrot.slane %v1522_v27, %v1528_v50  ;;  %v1552_v62 = vrot.slane %v1538_v31, %v1528_v50 }
 0x402   :  { %v1453_v40 = vpop.f32.mrb[18].mxu0 }
 0x403   :  { %v1380_v41 = vpop.f32.mrb[18].mxu1  ;;  %v1505_v42 = vcombine.low %v1307_v25, %v1453_v40  ;;  %v1506_v43 = vcombine.high %v1307_v25, %v1453_v40  ;;  %v1819_v44 = vpop.f32.mrb[19].mxu0 }
 0x404   :  { %v1489_v45 = vcombine.low %v1234_v32, %v1380_v41  ;;  %v1490_v46 = vcombine.high %v1234_v32, %v1380_v41  ;;  %v1814_v47 = vpop.f32.mrb[19].mxu1 }
 0x405   :  { %v1513_v48 = vrot.slane %v1505_v42, %v1464_v15  ;;  %v1520_v49 = vrot.slane %v1506_v43, %v1464_v15 }
 0x406   :  { %v1497_v51 = vrot.slane %v1489_v45, %v1464_v15  ;;  %v1504_v52 = vrot.slane %v1490_v46, %v1464_v15 }
 0x408   :  { %v1553_v53 = vcombine.low %v1497_v51, %v1513_v48  ;;  %v1554_v54 = vcombine.high %v1497_v51, %v1513_v48  ;;  %v1569_v55 = vcombine.low %v1504_v52, %v1520_v49  ;;  %v1570_v56 = vcombine.high %v1504_v52, %v1520_v49 }
 0x40a   :  { %v1577_v59 = vrot.slane %v1569_v55, %v1528_v50  ;;  %v1561_v60 = vrot.slane %v1553_v53, %v1528_v50  ;;  %v1568_v61 = vrot.slane %v1554_v54, %v1528_v50  ;;  %v1584_v36 = vrot.slane %v1570_v56, %v1528_v50 }
 0x40c   :  { %v1590_v63 = vcombine.high %v1545_v57, %v1577_v59  ;;  %v1586_v0 = vcombine.high %v1529_v58, %v1561_v60  ;;  %v1587_v37 = vcombine.low %v1536_v28, %v1568_v61  ;;  %v1588_v1 = vcombine.high %v1536_v28, %v1568_v61 }
 0x40d   :  { %v1591_v2 = vcombine.low %v1552_v62, %v1584_v36  ;;  %v1592_v29 = vcombine.high %v1552_v62, %v1584_v36  ;;  %v1589_v3 = vcombine.low %v1545_v57, %v1577_v59  ;;  %v1585_v4 = vcombine.low %v1529_v58, %v1561_v60 }
 0x40e   :  { %1606 = vrot.lane.b32.xlu1 %v1590_v63, %s1952_s2  ;;  %1594 = vrot.lane.b32.xlu0 %v1586_v0, %s1952_s2 }
 0x412   :  { %1598 = vrot.lane.b32.xlu1 %v1587_v37, %s1953_s11  ;;  %1602 = vrot.lane.b32.xlu0 %v1588_v1, %s1954_s12 }
 0x416   :  { %1610 = vrot.lane.b32.xlu1 %v1591_v2, %s1953_s11 }
 0x41a   :  { %1614 = vrot.lane.b32.xlu1 %v1592_v29, %s1954_s12 }
 0x480   :  { %v1607_v5 = vpop.permute.xlu1 %1606  ;;  %v1595_v6 = vpop.permute.xlu0 %1594 }
 0x481   :  { %v1617_v35 = vsel %vm62_vm0, %v1585_v4, %v1595_v6  ;;  %v1622_v11 = vsel %vm62_vm0, %v1589_v3, %v1607_v5 }
 0x484   :  { %v1599_v7 = vpop.permute.xlu1 %1598  ;;  %v1603_v8 = vpop.permute.xlu0 %1602 }
 0x485   :  { %v1619_v9 = vsel %vm1618_vm3, %v1617_v35, %v1599_v7 }
 0x486   :  { %v1621_v39 = vsel %vm1620_vm4, %v1619_v9, %v1603_v8 }
 0x487   :  { %1625 = vst [vmem:[#allocation7] sm:$0xff] %v1621_v39 }
 0x488   :  { %v1611_v10 = vpop.permute.xlu1 %1610 }
 0x489   :  { %v1623_v12 = vsel %vm1618_vm3, %v1622_v11, %v1611_v10 }
 0x48c   :  { %v1615_v13 = vpop.permute.xlu1 %1614 }
 0x48d   :  { %v1624_v15 = vsel %vm1620_vm4, %v1623_v12, %v1615_v13 }
 0x48e   :  { %1626 = vst [vmem:[#allocation7 + $0x8] sm:$0xff] %v1624_v15 }
 0x48f   :  { %1927 = shalt.err (!%p1924_p6)
}
 0x490   :  { %s1928_s18 = scalar_lea.hbm %s2146_s3, 256 }
 0x491   :  { %p1929_p7 = scmp.ne.s32.totalorder %s2146_s3, %s1928_s18  ;;  %p1932_p8 = scmp.lt.u32.totalorder %s1928_s18, %s2146_s3 }
 0x493   :  { %p1934_p9 = pnand %p1932_p8, %p1929_p7 }
 0x495   :  { %1937 = shalt.err (!%p1934_p9)
}
 0x496   :  { %1636 = dma.vmem_to_hbm [thread:$0]  %s1634_s14, 256, %s2146_s3, [#allocation4]  }
 0x497   :  { %1942 = dma.done.wait [#allocation4], 256  }
 0x498   :  { %1943 = vsyncadd [#allocation4], 4294967040 }
 0x499   :  { %1640 = vsyncpa [#allocation3], 1 }
 0x49a   :  { %1641 = vsyncpa [#allocation6], 1 }
 0x49b   :  { %1642 = vsyncpa [#allocation4], 1 }

</bundles_post_ra>
